<compile_context>
chip_gen: v5e
topology: v5e:2x2
jax: 0.10.0
libtpu: 0.0.40
codegen_flags: <defaults>
</compile_context>

<pallas_src>
import functools

import jax
import jax.numpy as jnp
from jax.experimental import pallas as pl
from jax.experimental.pallas import tpu as pltpu

# Finite mask value; safe because self-loops guarantee every valid dst node has at
# least one unmasked entry, so the later rescale exp(_NEG_BIG - m_real) underflows
# to exactly 0.0 in f32 (GATConv add_self_loops=True default).
_NEG_BIG = -1e30
# MXU operand dtype.  jnp.float32 matches the f32 reference bit-tightly; set
# jnp.bfloat16 on v6e/v7x for ~3x MXU throughput (f32 accumulation is kept).
_MXU_DTYPE = jnp.float32


def _round_up(x, m):
    return ((x + m - 1) // m) * m


@functools.lru_cache(maxsize=None)
def _vmem_limit_bytes():
    # 3/4 of physical VMEM leaves headroom for double buffers + Mosaic internal scratch:
    # ~96 MiB on v5e/v6e (128 MiB), ~48 MiB on v7x (64 MiB per TensorCore).
    try:
        cap = int(pltpu.get_tpu_info().vmem_capacity_bytes)
    except Exception:  # pragma: no cover - conservative fallback
        cap = 64 * 1024 * 1024
    return min((cap * 3) // 4, 96 * 1024 * 1024)


# --------------------------- kernel 1: projection -----------------------------
def _proj_kernel(xt_ref, wt_ref, at_ref, ht_ref, alphas_ref):
    # h_t = W^T @ x_t : [H*C, block_n]  (lane-dense along nodes, no in-kernel transpose)
    h_t = jnp.dot(wt_ref[...].astype(_MXU_DTYPE), xt_ref[...].astype(_MXU_DTYPE),
                  preferred_element_type=jnp.float32)
    ht_ref[0] = h_t
    # alpha_src / alpha_dst for all heads in one MXU matmul: [2H, block_n]
    alphas_ref[...] = jnp.dot(at_ref[...].astype(_MXU_DTYPE), h_t.astype(_MXU_DTYPE),
                              preferred_element_type=jnp.float32)


def _project(x_t, w_t, a_t, *, block_n):
    f_in, n_pad = x_t.shape
    hc = w_t.shape[0]
    two_h = a_t.shape[0]
    n_tiles = n_pad // block_n
    return pl.pallas_call(
        _proj_kernel,
        out_shape=(jax.ShapeDtypeStruct((n_tiles, hc, block_n), jnp.float32),
                   jax.ShapeDtypeStruct((two_h, n_pad), jnp.float32)),
        grid_spec=pltpu.PrefetchScalarGridSpec(
            num_scalar_prefetch=0,
            grid=(n_tiles,),
            in_specs=[pl.BlockSpec((f_in, block_n), lambda i: (0, i)),
                      pl.BlockSpec((hc, f_in), lambda i: (0, 0)),
                      pl.BlockSpec((two_h, hc), lambda i: (0, 0))],
            out_specs=[pl.BlockSpec((1, hc, block_n), lambda i: (i, 0, 0)),
                       pl.BlockSpec((two_h, block_n), lambda i: (0, i))]),
        compiler_params=pltpu.CompilerParams(
            dimension_semantics=("parallel",),
            vmem_limit_bytes=_vmem_limit_bytes()),
    )(x_t, w_t, a_t)


# --------------------------- kernel 2: attention -------------------------------
def _attn_kernel(cnt_ref, sid_ref, adjt_ref, ht_ref, asrc_ref, adst_ref, bias_ref,
                 out_ref, m_ref, l_ref, acc_ref, *, heads, out_ch, apply_relu):
    i = pl.program_id(0)
    k = pl.program_id(1)

    @pl.when(k == 0)
    def _init():
        m_ref[...] = jnp.full(m_ref.shape, _NEG_BIG, jnp.float32)
        l_ref[...] = jnp.zeros(l_ref.shape, jnp.float32)
        acc_ref[...] = jnp.zeros(acc_ref.shape, jnp.float32)

    @pl.when(k < cnt_ref[i])          # skip src tiles with no edges into this dst tile
    def _compute():
        j = sid_ref[i, k]             # actual (non-empty) src tile handled by this step
        # Additive mask bias, computed once per tile (1 select instead of one per head).
        mask_bias = jnp.where(adjt_ref[...] != 0, 0.0, _NEG_BIG)        # [Ts, Td]
        h_blk = ht_ref[j]                                               # [H*C, Ts] resident

        # Static loop over heads (8 / 1); each head's temporaries terminate in scratch
        # stores, bounding their live ranges.
        for hd in range(heads):
            a_s = asrc_ref[:, hd:hd + 1]                                # [Ts, 1]
            a_d = adst_ref[hd:hd + 1, :]                                # [1, Td]
            e = a_s + a_d                                               # [Ts, Td]
            s = jnp.where(e > 0, e, 0.2 * e) + mask_bias                # leaky_relu + mask

            # Online (flash-style) softmax over the src (sublane) axis.
            m_prev = m_ref[hd]                                          # [1, Td]
            m_new = jnp.maximum(m_prev, jnp.max(s, axis=0, keepdims=True))
            scale = jnp.exp(m_prev - m_new)
            p = jnp.exp(s - m_new)                                      # [Ts, Td]
            l_ref[hd] = scale * l_ref[hd] + jnp.sum(p, axis=0, keepdims=True)
            h_src = h_blk[hd * out_ch:(hd + 1) * out_ch, :]             # [C, Ts]
            acc_ref[hd] = scale * acc_ref[hd] + jnp.dot(
                h_src.astype(_MXU_DTYPE), p.astype(_MXU_DTYPE),
                preferred_element_type=jnp.float32)                     # [C, Td] lane-dense
            m_ref[hd] = m_new

    @pl.when(k == pl.num_programs(1) - 1)
    def _finalize():
        parts = []
        for hd in range(heads):
            inv = pl.reciprocal(l_ref[hd])          # exact; once per head per dst tile
            parts.append(acc_ref[hd] * inv)
        out = parts[0] if heads == 1 else jnp.concatenate(parts, axis=0)  # [H*C, Td]
        out = out + bias_ref[...]
        if apply_relu:
            out = jnp.maximum(out, 0.0)
        out_ref[...] = out.astype(out_ref.dtype)    # one 128-lane-dense store per dst tile


def _attention(counts, src_ids, adjt_i8, ht3, alpha_src, alpha_dst_t, bias_t, *,
               heads, out_ch, apply_relu, block):
    n_tiles, hc, _ = ht3.shape
    n_pad = n_tiles * block
    kernel = functools.partial(_attn_kernel, heads=heads, out_ch=out_ch,
                               apply_relu=apply_relu)
    return pl.pallas_call(
        kernel,
        out_shape=jax.ShapeDtypeStruct((hc, n_pad), jnp.float32),
        grid_spec=pltpu.PrefetchScalarGridSpec(
            num_scalar_prefetch=2,        # counts [n_tiles], src_ids [n_tiles, n_tiles]
            grid=(n_tiles, n_tiles),
            in_specs=[
                # adjacency transposed [src, dst], int8, data-dependent src-tile index
                # (clamped repeats on skipped steps => no re-DMA).
                pl.BlockSpec((block, block), lambda i, k, cnt, sid: (sid[i, k], i)),
                # projected features: whole array VMEM resident across the grid.
                pl.BlockSpec((n_tiles, hc, block), lambda i, k, cnt, sid: (0, 0, 0)),
                # alpha_src node-major [N, H] (one column per head), data-dependent tile.
                pl.BlockSpec((block, heads), lambda i, k, cnt, sid: (sid[i, k], 0)),
                # alpha_dst transposed [H, N], per dst tile (lane-dense).
                pl.BlockSpec((heads, block), lambda i, k, cnt, sid: (0, i)),
                # bias transposed [H*C, 1].
                pl.BlockSpec((hc, 1), lambda i, k, cnt, sid: (0, 0)),
            ],
            out_specs=pl.BlockSpec((hc, block), lambda i, k, cnt, sid: (0, i)),
            scratch_shapes=[
                pltpu.VMEM((heads, 1, block), jnp.float32),        # running max
                pltpu.VMEM((heads, 1, block), jnp.float32),        # running denominator
                pltpu.VMEM((heads, out_ch, block), jnp.float32),   # PV accumulator
            ]),
        compiler_params=pltpu.CompilerParams(
            dimension_semantics=("parallel", "arbitrary"),
            vmem_limit_bytes=_vmem_limit_bytes()),
    )(counts, src_ids, adjt_i8, ht3, alpha_src, alpha_dst_t, bias_t)


# ------------------------------- layer / model ---------------------------------
def _build_alpha_proj_t(att_src, att_dst):
    """A^T [2H, H*C]: alphas_t = A^T @ h_t; rows [0:H] -> alpha_src, [H:2H] -> alpha_dst."""
    heads, out_ch = att_src.shape
    eye = jnp.eye(heads, dtype=jnp.float32)
    src_rows = (eye[:, :, None] * att_src[None, :, :]).reshape(heads, heads * out_ch)
    dst_rows = (eye[:, :, None] * att_dst[None, :, :]).reshape(heads, heads * out_ch)
    return jnp.concatenate([src_rows, dst_rows], axis=0)


def gat_layer(x_t, adjt_i8, counts, src_ids, w, att_src, att_dst, bias, *,
              apply_relu, block):
    heads, out_ch = att_src.shape
    w_t = jnp.transpose(w)                         # [H*C, F_in]
    a_t = _build_alpha_proj_t(att_src, att_dst)    # [2H, H*C]
    bias_t = jnp.transpose(bias)                   # [H*C, 1]
    ht3, alphas_t = _project(x_t, w_t, a_t, block_n=block)
    # Wrapper-side layout plumbing (tiny O(N*H) transposes, once per layer).
    alpha_src = jnp.transpose(alphas_t[:heads, :])  # [N_pad, H]: column per head
    alpha_dst_t = alphas_t[heads:, :]               # [H, N_pad]: lane-dense along N
    return _attention(counts, src_ids, adjt_i8, ht3, alpha_src, alpha_dst_t, bias_t,
                      heads=heads, out_ch=out_ch, apply_relu=apply_relu, block=block)


def _tile_skip_metadata(adj_p, block):
    """Per dst tile: count and (clamped) ascending list of non-empty src tiles."""
    n_pad = adj_p.shape[0]
    n_tiles = n_pad // block
    nnz = adj_p.astype(jnp.int32).reshape(n_tiles, block, n_tiles, block).sum(axis=(1, 3))
    nonempty = nnz > 0
    counts = jnp.sum(nonempty, axis=1).astype(jnp.int32)
    # Stable argsort puts the non-empty src-tile indices first, in ascending order.
    order = jnp.argsort(1 - nonempty.astype(jnp.int32), axis=1, stable=True).astype(jnp.int32)
    counts = jnp.maximum(counts, 1)    # run >=1 step so scratch / outputs stay finite
    last = jnp.take_along_axis(order, (counts - 1)[:, None], axis=1)
    pos = jnp.arange(n_tiles, dtype=jnp.int32)[None, :]
    src_ids = jnp.where(pos < counts[:, None], order, last).astype(jnp.int32)
    return counts, src_ids


def gat_forward(params, x, adj, *, block=128):
    """Eval-mode GAT forward (F.dropout == identity).
    adj[dst, src] = 1 for every edge src->dst, self-loops included."""
    n, f_in = x.shape
    n_pad = _round_up(max(n, block), block)
    # Feature-major, node-lane-dense layouts; padded node columns are zero.  Padded
    # src columns have adj==0, mask to -1e30 and rescale to exactly 0 in the online
    # softmax of valid dst nodes; padded dst columns hold finite garbage that is
    # sliced off at the end.
    x_t = jnp.zeros((f_in, n_pad), jnp.float32).at[:, :n].set(jnp.transpose(x))
    adj_p = jnp.zeros((n_pad, n_pad), jnp.int8).at[:n, :n].set(adj.astype(jnp.int8))
    adjt = jnp.transpose(adj_p)                           # [src, dst], int8
    counts, src_ids = _tile_skip_metadata(adj_p, block)   # graph is shared by both layers

    h1_t = gat_layer(x_t, adjt, counts, src_ids, params["w1"], params["att_src1"],
                     params["att_dst1"], params["bias1"], apply_relu=True, block=block)
    out_t = gat_layer(h1_t, adjt, counts, src_ids, params["w2"], params["att_src2"],
                      params["att_dst2"], params["bias2"], apply_relu=False, block=block)
    return jnp.transpose(out_t)[:n]


# ----------------------------- pure-JAX reference ------------------------------
def gat_layer_ref(x, w, att_src, att_dst, bias, adj, apply_relu):
    n = x.shape[0]
    heads, out_ch = att_src.shape
    h = (x @ w).reshape(n, heads, out_ch)
    a_src = (h * att_src[None]).sum(-1)                   # [N, H]
    a_dst = (h * att_dst[None]).sum(-1)                   # [N, H]
    logits = a_dst[:, None, :] + a_src[None, :, :]        # [N_dst, N_src, H]
    logits = jnp.where(logits > 0, logits, 0.2 * logits)
    logits = jnp.where(adj[:, :, None] > 0, logits, -1e30)
    attn = jax.nn.softmax(logits, axis=1)
    out = jnp.einsum('ijh,jhc->ihc', attn, h).reshape(n, heads * out_ch) + bias
    return jnp.maximum(out, 0.0) if apply_relu else out


def gat_forward_ref(params, x, adj):
    h = gat_layer_ref(x, params["w1"], params["att_src1"], params["att_dst1"],
                      params["bias1"], adj, apply_relu=True)
    return gat_layer_ref(h, params["w2"], params["att_src2"], params["att_dst2"],
                         params["bias2"], adj, apply_relu=False)


def make_params(key, input_dim, hidden_dim, output_dim, in_head=8, out_head=1):
    ks = jax.random.split(key, 8)
    scale = 0.1
    return {
        # gat1: GATConv(input_dim, hidden_dim, heads=8)
        "w1":       scale * jax.random.normal(ks[0], (input_dim, in_head * hidden_dim), jnp.float32),
        "att_src1": scale * jax.random.normal(ks[1], (in_head, hidden_dim), jnp.float32),
        "att_dst1": scale * jax.random.normal(ks[2], (in_head, hidden_dim), jnp.float32),
        "bias1":    scale * jax.random.normal(ks[3], (1, in_head * hidden_dim), jnp.float32),
        # gat2: GATConv(hidden_dim*8, output_dim, heads=1)
        "w2":       scale * jax.random.normal(ks[4], (in_head * hidden_dim, out_head * output_dim), jnp.float32),
        "att_src2": scale * jax.random.normal(ks[5], (out_head, output_dim), jnp.float32),
        "att_dst2": scale * jax.random.normal(ks[6], (out_head, output_dim), jnp.float32),
        "bias2":    scale * jax.random.normal(ks[7], (1, out_head * output_dim), jnp.float32),
    }


if __name__ == "__main__":
    key = jax.random.PRNGKey(0)
    k_x, k_p = jax.random.split(key)

    # Small synthetic graph: bidirectional ring.  N=300 -> padded to 384 so the
    # attention kernel runs a real 3x3 (dst, src) grid with online softmax and
    # exercises the scalar-prefetch tile-skip metadata.
    N, INPUT_DIM, HIDDEN_DIM, OUTPUT_DIM = 300, 8, 8, 4
    src = jnp.concatenate([jnp.arange(N), (jnp.arange(N) + 1) % N])
    dst = jnp.concatenate([(jnp.arange(N) + 1) % N, jnp.arange(N)])
    adj = jnp.zeros((N, N), jnp.float32).at[dst, src].set(1.0)
    adj = jnp.maximum(adj, jnp.eye(N, dtype=jnp.float32))     # self-loops (GATConv default)

    x = jax.random.normal(k_x, (N, INPUT_DIM), jnp.float32)
    params = make_params(k_p, INPUT_DIM, HIDDEN_DIM, OUTPUT_DIM)

    out = gat_forward(params, x, adj, block=128)
    out = jax.block_until_ready(out)

    ref = gat_forward_ref(params, x, adj)
    assert out.shape == (N, OUTPUT_DIM), out.shape
    err = jnp.max(jnp.abs(out - ref))
    assert jnp.allclose(out, ref, rtol=2e-3, atol=2e-3), f"max abs err {err}"

    print("KERNEL_OK")
</pallas_src>

<mosaic_0001>
module attributes {stable_mosaic.version = 11 : i64} {
  func.func @_proj_kernel(%arg0: i32, %arg1: memref<8x128xf32, #tpu.memory_space<vmem>>, %arg2: memref<64x8xf32, #tpu.memory_space<vmem>>, %arg3: memref<16x64xf32, #tpu.memory_space<vmem>>, %arg4: memref<1x64x128xf32, #tpu.memory_space<vmem>>, %arg5: memref<16x128xf32, #tpu.memory_space<vmem>>) attributes {dimension_semantics = [#tpu.dimension_semantics<parallel>], iteration_bounds = array<i64: 3>, scalar_prefetch = 0 : i64, scratch_operands = 0 : i64, tpu.core_type = #tpu.core_type<tc>, window_params = [{transform_indices = @transform_0, window_bounds = array<i64: 8, 128>}, {pipeline_mode = #tpu.pipeline_mode<synchronous>, transform_indices = @transform_1, window_bounds = array<i64: 64, 8>}, {pipeline_mode = #tpu.pipeline_mode<synchronous>, transform_indices = @transform_2, window_bounds = array<i64: 16, 64>}, {transform_indices = @transform_3, window_bounds = array<i64: 1, 64, 128>}, {transform_indices = @transform_4, window_bounds = array<i64: 16, 128>}]} {
    %c0 = arith.constant 0 : index
    %c0_0 = arith.constant 0 : index
    %0 = vector.load %arg2[%c0, %c0_0] : memref<64x8xf32, #tpu.memory_space<vmem>>, vector<64x8xf32>
    %c0_1 = arith.constant 0 : index
    %c0_2 = arith.constant 0 : index
    %1 = vector.load %arg1[%c0_1, %c0_2] : memref<8x128xf32, #tpu.memory_space<vmem>>, vector<8x128xf32>
    %cst = arith.constant dense<0.000000e+00> : vector<64x128xf32>
    %2 = tpu.matmul %0, %1, %cst {dimension_numbers = #tpu.dot_dimension_numbers<[1], [0], [0], [1], [0, 0, 1, 1], [], []>} : vector<64x8xf32>, vector<8x128xf32>, vector<64x128xf32> -> vector<64x128xf32>
    %c0_3 = arith.constant 0 : index
    %c0_4 = arith.constant 0 : index
    %c0_5 = arith.constant 0 : index
    %3 = vector.load %arg4[%c0_3, %c0_4, %c0_5] : memref<1x64x128xf32, #tpu.memory_space<vmem>>, vector<1x64x128xf32>
    %4 = vector.shape_cast %3 : vector<1x64x128xf32> to vector<64x128xf32>
    %5 = vector.shape_cast %2 : vector<64x128xf32> to vector<1x64x128xf32>
    tpu.vector_store %arg4[%c0_3, %c0_4, %c0_5], %5 {strides = array<i32>} : memref<1x64x128xf32, #tpu.memory_space<vmem>>, vector<1x64x128xf32>,
    %c0_6 = arith.constant 0 : index
    %c0_7 = arith.constant 0 : index
    %6 = vector.load %arg3[%c0_6, %c0_7] : memref<16x64xf32, #tpu.memory_space<vmem>>, vector<16x64xf32>
    %cst_8 = arith.constant dense<0.000000e+00> : vector<16x128xf32>
    %7 = tpu.matmul %6, %2, %cst_8 {dimension_numbers = #tpu.dot_dimension_numbers<[1], [0], [0], [1], [0, 0, 1, 1], [], []>} : vector<16x64xf32>, vector<64x128xf32>, vector<16x128xf32> -> vector<16x128xf32>
    %c0_9 = arith.constant 0 : index
    %c0_10 = arith.constant 0 : index
    %8 = vector.load %arg5[%c0_9, %c0_10] : memref<16x128xf32, #tpu.memory_space<vmem>>, vector<16x128xf32>
    tpu.vector_store %arg5[%c0_9, %c0_10], %7 {strides = array<i32>} : memref<16x128xf32, #tpu.memory_space<vmem>>, vector<16x128xf32>,
    return
  }
  func.func @transform_0(%arg0: i32) -> (i32, i32) {
    %c0_i32 = arith.constant 0 : i32
    %c0_i32_0 = arith.constant 0 : i32
    return %c0_i32, %arg0 : i32, i32
  }
  func.func @transform_1(%arg0: i32) -> (i32, i32) {
    %c0_i32 = arith.constant 0 : i32
    %c0_i32_0 = arith.constant 0 : i32
    %c0_i32_1 = arith.constant 0 : i32
    return %c0_i32, %c0_i32_0 : i32, i32
  }
  func.func @transform_2(%arg0: i32) -> (i32, i32) {
    %c0_i32 = arith.constant 0 : i32
    %c0_i32_0 = arith.constant 0 : i32
    %c0_i32_1 = arith.constant 0 : i32
    return %c0_i32, %c0_i32_0 : i32, i32
  }
  func.func @transform_3(%arg0: i32) -> (i32, i32, i32) {
    %c0_i32 = arith.constant 0 : i32
    %c0_i32_0 = arith.constant 0 : i32
    %c0_i32_1 = arith.constant 0 : i32
    return %arg0, %c0_i32, %c0_i32_0 : i32, i32, i32
  }
  func.func @transform_4(%arg0: i32) -> (i32, i32) {
    %c0_i32 = arith.constant 0 : i32
    %c0_i32_0 = arith.constant 0 : i32
    return %c0_i32, %arg0 : i32, i32
  }
}

</mosaic_0001>

<bundles_post_ra>
// kernel: tpu_custom_call.1
= control target key start
LH: loop header
LB: loop body
LE: loop exit
PB: predicated region body
PF: predicated region fallthrough
CT: control target
= control target key end

     0   :  { %10 = vsyncpa [#allocation3], 0  ;;  %s818_s0 = inlined_call_operand.vmem [shape: f32[8,384], index: 0, kind: input, shape index: {}]   ;;  %s819_s1 = inlined_call_operand.vmem [shape: f32[64,8], index: 1, kind: input, shape index: {}]   ;;  %s820_s2 = inlined_call_operand.vmem [shape: f32[16,64], index: 2, kind: input, shape index: {}]   ;;  %s821_s3 = inlined_call_operand.hbm [shape: f32[3,64,128], index: 3, kind: output, shape index: {0}]   ;;  %s822_s4 = inlined_call_operand.hbm [shape: f32[16,384], index: 4, kind: output, shape index: {1}]  }
   0x1   :  { %12 = vsyncpa [#allocation3 + $0x1], 0 }
   0x2   :  { %13 = vsyncpa [#allocation5], 0 }
   0x3   :  { %15 = vsyncpa [#allocation5 + $0x1], 0  ;;  %s659_s15 = smov 0   ;;  %s661_s16 = smov 0  }
   0x4   :  { %s663_s17 = smov 0   ;;  %s665_s18 = smov 0  }
   0x5 LB: > { %s680_s19 = sadd.s32 4294967295, %s629_s18   ;;  %s453_s20 = sadd.s32 4294967294, %s629_s18   ;;  %s629_s18 = sphi %s665_s18, %s828_s18   ;;  %s625_s17 = sphi %s663_s17, %s827_s17   ;;  %s621_s16 = sphi %s661_s16, %s826_s16   ;;  %s617_s15 = sphi %s659_s15, %s825_s15  }
   0x6   : > { %s684_s21 = sadd.s32 1, %s629_s18   ;;  %s96_s22 = sadd.s32 1, %s625_s17 }
   0x7   : > { %s93_s23 = ssub.s32 %s629_s18, %s684_s21  ;;  %p106_p0 = scmp.ne.s32.totalorder %s625_s17, %s621_s16 }
   0x8   : > { %p94_p1 = scmp.eq.s32.totalorder %s93_s23, 0  ;;  %p107_p2 = scmp.eq.s32.totalorder %s680_s19, 2 }
   0x9   : > { %p112_p3 = scmp.ne.s32.totalorder %s621_s16, %s617_s15  ;;  %p113_p4 = scmp.eq.s32.totalorder %s453_s20, 2 }
   0xa   : > { %s695_s24 = scalar_select %p94_p1, %s625_s17, %s96_s22  }
   0xb   : > { %p697_p5 = por %p107_p2, %p106_p0  ;;  %p701_p6 = por %p113_p4, %p112_p3 }
   0xc   : > { %p456_p7 = scmp.ge.s32.totalorder %s629_s18, 1  ;;  %p170_p8 = scmp.lt.s32.totalorder %s629_s18, 4 }
   0xe   : > { %p171_p9 = pnand %p456_p7, %p170_p8 }
   0xf   : > { %p200_p10 = scmp.lt.s32.totalorder (!%p171_p9), %s680_s19, 2  ;;  %s477_s12 = sshll.u32 (!%p171_p9), %s680_s19, 6 }
  0x10   : > { %174 = sbr.rel (%p171_p9) target bundleno = 322 (0x142), region = 32  ;;  %s338_s20 = scalar_lea.hbm (!%p171_p9), %s821_s3, %s477_s12 }
  0x11   : > { %s341_s23 = sshll.u32 (!%p171_p9), %s338_s20, 4  ;;  %s555_s8 = scalar_lea.hbm (!%p171_p9), %s821_s3, 192  ;;  %s342_s23 = int_to_ptr.hbm [resolvable:$true] %s341_s23 }
  0x15   : > { %s201_s27 = scalar_select %p200_p10, %s680_s19, 2  ;;  %v207_v0 = vld [vmem:[%s819_s1 + $0x18] sm:$0xff]  ;;  %vm213_vm0 = vcmask 64512   ;;  %v210_v1 = vld [vmem:[%s819_s1 + $0x30] sm:$0xff]  ;;  %v204_v3 = vld [vmem:[%s819_s1] sm:$0xff]  ;;  %vm289_vm1 = vcmask 523264  }
  0x16   : > { %v208_v4 = vld [vmem:[%s819_s1 + $0x20] sm:$0xff]  ;;  %v211_v5 = vld [vmem:[%s819_s1 + $0x38] sm:$0xff]  ;;  %v205_v6 = vld [vmem:[%s819_s1 + $0x8] sm:$0xff] }
  0x17   : > { %s459_s28 = sshll.u32 %s201_s27, 3  ;;  %v209_v7 = vld [vmem:[%s819_s1 + $0x28] sm:$0xff]  ;;  %v206_v8 = vld [vmem:[%s819_s1 + $0x10] sm:$0xff]  ;;  %v287_v18 = vld [vmem:[%s820_s2] sm:$0xff] }
  0x18   : > { %s203_s5 = scalar_lea.vmem %s818_s0, %s459_s28  ;;  %v288_v17 = vld [vmem:[%s820_s2 + $0x8] sm:$0xff]  ;;  %s549_s28 = sshra.s32 %s342_s23, 4  ;;  %s550_s28 = int_to_ptr.hbm [resolvable:$true] %s549_s28 }
  0x19   : > { %v212_v2 = vld [vmem:[%s203_s5] sm:$0xff]  ;;  %s745_s5 = sand.u32 1, %s621_s16   ;;  %s551_s29 = scalar_lea.hbm %s550_s28, 64 }
  0x1a   : > { %478 = vmatpush.msra.mxu2 %v212_v2  ;;  %479 = vmatpush.msra.mxu3 %v212_v2  ;;  %s457_s6 = sshll.u32 %s745_s5, 6  ;;  %s322_s27 = scalar_lea.sflag [#allocation3], %s745_s5 }
  0x1b   : > { %463 = vmatmul.msk.f32.vlgmr.msra.gmra.mxu2 %vm213_vm0, %v207_v0  ;;  %466 = vmatmul.msk.f32.vlgmr.msra.gmra.mxu3 %vm213_vm0, %v210_v1  ;;  %s748_s7 = scalar_lea.vmem [#allocation2], %s457_s6  ;;  %p552_p11 = scmp.ne.s32.totalorder %s550_s28, %s551_s29 }
  0x1c   : > { %253 = vmatpush.msra.mxu0 %v212_v2  ;;  %s339_s22 = sshll.u32 %s748_s7, 4  ;;  %p556_p0 = scmp.lt.s32.totalorder %s550_s28, %s821_s3  ;;  %s340_s22 = int_to_ptr.vmem [resolvable:$true] %s339_s22 }
  0x1d   : > { %460 = vmatmul.msk.f32.vlgmr.msra.gmra.mxu0 %vm213_vm0, %v204_v3  ;;  %p553_p12 = pnand %p552_p11, %p697_p5  ;;  %p557_p1 = scmp.lt.s32.totalorder %s555_s8, %s551_s29 }
  0x1f   : > { %p554_p13 = pneg %p553_p12  ;;  %p558_p2 = por %p557_p1, %p556_p0 }
  0x21   : > { %p559_p3 = pnand %p558_p2, %p554_p13 }
  0x23   : > { %464 = vmatmul.msk.f32.gmra.mxu2 %vm213_vm0, %v208_v4  ;;  %467 = vmatmul.msk.f32.gmra.mxu3 %vm213_vm0, %v211_v5 }
  0x25   : > { %461 = vmatmul.msk.f32.gmra.mxu0 %vm213_vm0, %v205_v6 }
  0x2b   : > { %465 = vmatmul.msk.f32.gmra.mxu2 %vm213_vm0, %v209_v7 }
  0x2d   : > { %462 = vmatmul.msk.f32.gmra.mxu0 %vm213_vm0, %v206_v8 }
  0x9a   : > { %v255_v9 = vpop.f32.mrf.mxu0 }
  0x9b   : > { %279 = vst [vmem:[%s748_s7] sm:$0xff] %v255_v9 }
  0x9e   : > { %v264_v10 = vpop.f32.mrf.mxu2  ;;  %v273_v11 = vpop.f32.mrf.mxu3 }
  0x9f   : > { %282 = vst [vmem:[%s748_s7 + $0x18] sm:$0xff] %v264_v10 }
  0xa0   : > { %285 = vst [vmem:[%s748_s7 + $0x30] sm:$0xff] %v273_v11 }
  0xa2   : > { %v258_v12 = vpop.f32.mrf.mxu0 }
  0xa3   : > { %280 = vst [vmem:[%s748_s7 + $0x8] sm:$0xff] %v258_v12 }
  0xa6   : > { %v267_v13 = vpop.f32.mrf.mxu2  ;;  %v276_v14 = vpop.f32.mrf.mxu3 }
  0xa7   : > { %283 = vst [vmem:[%s748_s7 + $0x20] sm:$0xff] %v267_v13  ;;  %304 = vmatpush.msra.mxu1 %v276_v14  ;;  %480 = vmatpush.msrb.mxu3 %v276_v14 }
  0xa8   : > { %286 = vst [vmem:[%s748_s7 + $0x38] sm:$0xff] %v276_v14 }
  0xa9   : > { %305 = vmatpush.msra.mxu1 %v273_v11  ;;  %481 = vmatpush.msrb.mxu3 %v273_v11 }
  0xaa   : > { %v261_v15 = vpop.f32.mrf.mxu0 }
  0xab   : > { %281 = vst [vmem:[%s748_s7 + $0x10] sm:$0xff] %v261_v15 }
  0xae   : > { %v270_v16 = vpop.f32.mrf.mxu2 }
  0xaf   : > { %284 = vst [vmem:[%s748_s7 + $0x28] sm:$0xff] %v270_v16  ;;  %306 = vmatpush.msra.mxu1 %v270_v16  ;;  %482 = vmatpush.msrb.mxu3 %v270_v16 }
  0xb1   : > { %307 = vmatpush.msra.mxu1 %v267_v13  ;;  %483 = vmatpush.msrb.mxu3 %v267_v13 }
  0xb3   : > { %308 = vmatpush.msra.mxu1 %v264_v10  ;;  %484 = vmatpush.msrb.mxu3 %v264_v10 }
  0xb5   : > { %309 = vmatpush.msra.mxu1 %v261_v15  ;;  %485 = vmatpush.msrb.mxu3 %v261_v15 }
  0xb7   : > { %310 = vmatpush.msra.mxu1 %v258_v12  ;;  %486 = vmatpush.msrb.mxu3 %v258_v12 }
  0xb9   : > { %311 = vmatpush.msra.mxu1 %v255_v9  ;;  %487 = vmatpush.msrb.mxu3 %v255_v9 }
  0xba   : > { %469 = vmatmul.msk.f32.vlgmr.msrb.gmra.mxu3 %vm289_vm1, %v288_v17  ;;  %468 = vmatmul.msk.f32.vlgmr.msra.gmra.mxu1 %vm289_vm1, %v287_v18 }
  0xbb   : > { %562 = shalt.err (!%p559_p3)
}
  0xbc   : > { %s631_s7 = smov 128   ;;  %s632_s11 = smov 8  }
  0xbd   : > { %488 = dma.vmem_to_hbm [thread:$0]  (%p697_p5), %s340_s22, 1024, %s342_s23, %s322_s27, %s631_s7, %s631_s7, %s632_s11  }
  0xbe   : > { %s458_s12 = sshll.u32 %s745_s5, 4  ;;  %s474_s13 = sshll.u32 %s680_s19, 3 }
  0xbf   : > { %s354_s28 = scalar_lea.hbm %s822_s4, %s474_s13  ;;  %s199_s29 = scalar_lea.vmem [#allocation4], %s458_s12 }
  0xc0   : > { %s355_s30 = sshll.u32 %s199_s29, 4  ;;  %s357_s6 = sshll.u32 %s354_s28, 4  ;;  %s356_s30 = int_to_ptr.vmem [resolvable:$true] %s355_s30  ;;  %s358_s6 = int_to_ptr.hbm [resolvable:$true] %s357_s6 }
  0xc1   : > { %s327_s8 = scalar_lea.sflag [#allocation5], %s745_s5  ;;  %s577_s9 = sshra.s32 %s358_s6, 4  ;;  %s578_s9 = int_to_ptr.hbm [resolvable:$true] %s577_s9 }
  0xc2   : > { %s579_s22 = scalar_lea.hbm %s578_s9, 16  ;;  %s583_s27 = scalar_lea.hbm %s822_s4, 48 }
  0xc3   : > { %p580_p4 = scmp.ne.s32.totalorder %s578_s9, %s579_s22  ;;  %p584_p9 = scmp.lt.s32.totalorder %s578_s9, %s822_s4 }
  0xc4   : > { %p585_p10 = scmp.lt.s32.totalorder %s583_s27, %s579_s22 }
  0xc5   : > { %p581_p7 = pnand %p580_p4, %p697_p5 }
  0xc6   : > { %p586_p11 = por %p585_p10, %p584_p9 }
  0xc7   : > { %p582_p8 = pneg %p581_p7 }
  0xc9   : > { %p587_p12 = pnand %p586_p11, %p582_p8 }
 0x137   : > { %v313_v19 = vpop.f32.mrf.mxu1 }
 0x138   : > { %319 = vst [vmem:[%s199_s29] sm:$0xff] %v313_v19 }
 0x13d   : > { %v316_v20 = vpop.f32.mrf.mxu3 }
 0x13e   : > { %320 = vst [vmem:[%s199_s29 + $0x8] sm:$0xff] %v316_v20 }
 0x13f   : > { %590 = shalt.err (!%p587_p12)
}
 0x140   : > { %s633_s5 = smov 384  }
 0x141   : > { %489 = dma.vmem_to_hbm [thread:$0]  (%p697_p5), %s356_s30, 256, %s358_s6, %s327_s8, %s631_s7, %s633_s5, %s632_s11  }
 0x142 PF: > { %p499_p13 = scmp.ge.s32.totalorder %s629_s18, 2  ;;  %s372_s13 = sand.u32 1, %s617_s15  }
 0x143   : > { %s373_s14 = scalar_lea.sflag [#allocation3], %s372_s13 }
 0x144   : > { %p493_p0 = pnand %p499_p13, %p701_p6 }
 0x146   : > { %p494_p1 = pneg %p493_p0 }
 0x148   : > { %608 = dma.done.wait (%p494_p1), %s373_s14, 1024  }
 0x149   : > { %610 = vsyncadd (%p494_p1), %s373_s14, 4294966272  ;;  %s383_s20 = scalar_lea.sflag [#allocation5], %s372_s13 }
 0x14a   : > { %612 = dma.done.wait (%p494_p1), %s383_s20, 256  }
 0x14b   : > { %614 = vsyncadd (%p494_p1), %s383_s20, 4294967040  ;;  %p18_p5 = scmp.ge.s32.totalorder %s684_s21, 5   ;;  %s825_s15 = smov %s621_s16 }
 0x14c   : > { %s826_s16 = smov %s625_s17  ;;  %s827_s17 = smov %s695_s24 }
 0x14d   : > { %s828_s18 = smov %s684_s21  ;;  %20 = sbr.rel (!%p18_p5) target bundleno = 5 (0x5), region = 84 }
 0x152   :  { %389 = vsyncpa [#allocation3], 1 }
 0x153   :  { %391 = vsyncpa [#allocation3 + $0x1], 1 }
 0x154   :  { %392 = vsyncpa [#allocation5], 1 }
 0x155   :  { %394 = vsyncpa [#allocation5 + $0x1], 1 }

</bundles_post_ra>
